<compile_context>
chip_gen: v7x
topology: tpu7x:2x2x1
jax: 0.10.0
libtpu: 0.0.40
codegen_flags: <defaults>
</compile_context>

<pallas_src>
import functools

import numpy as np
import jax
import jax.numpy as jnp
from jax.experimental import pallas as pl
from jax.experimental.pallas import tpu as pltpu


def _diagnosis_kernel(x_ref, w_ref, wp_ref, b_ref, m_ref, out_ref, *,
                      c_out, tile_p, max_c):
    # x_ref : [3E, TILE_P*MAX_C] bf16  fused [stu;item;conc] features (entries = lanes)
    # w_ref : [2C, 3E]           bf16  fused block weight (rows 0..C-1 stu, C..2C-1 item)
    # wp_ref: [C, 1]             f32   predict-layer weight as a column
    # b_ref : [1, 1]             f32   predict-layer bias (SMEM scalar)
    # m_ref : [1, TILE_P*MAX_C]  f32   1/num_concepts for real entries, 0 for padding
    # out   : [1, TILE_P]        f32   per-(student,item) mean prediction
    h = jax.nn.sigmoid(
        jnp.dot(w_ref[...], x_ref[...],
                preferred_element_type=jnp.float32))        # [2C, T*M]
    diff = h[:c_out, :] - h[c_out:, :]                       # [C, T*M] stu - item
    s = jnp.sum(diff * wp_ref[...], axis=0, keepdims=True)   # [1, T*M] (VPU + XLU)
    p = jax.nn.sigmoid(s + b_ref[0, 0])                      # [1, T*M]
    pm = p * m_ref[...]                                      # mask already holds 1/cnt
    acc = pm[:, 0:tile_p]
    for ci in range(1, max_c):                               # static unrolled lane slices
        acc = acc + pm[:, ci * tile_p:(ci + 1) * tile_p]
    out_ref[...] = acc


def diagnosis_pallas(xT, wT_block, w_pred_col, b_pred, mask_row, *, tile_p, max_c):
    feat3, n_entries_pad = xT.shape
    two_c = wT_block.shape[0]
    c_out = two_c // 2
    tpm = tile_p * max_c
    assert n_entries_pad % tpm == 0
    n_blocks = n_entries_pad // tpm
    n_pairs_pad = n_blocks * tile_p

    kernel = functools.partial(_diagnosis_kernel, c_out=c_out,
                               tile_p=tile_p, max_c=max_c)
    out = pl.pallas_call(
        kernel,
        out_shape=jax.ShapeDtypeStruct((1, n_pairs_pad), jnp.float32),
        grid=(n_blocks,),
        in_specs=[
            pl.BlockSpec((feat3, tpm), lambda i: (0, i)),        # streamed entry slab
            pl.BlockSpec((two_c, feat3), lambda i: (0, 0)),      # resident fused weight
            pl.BlockSpec((c_out, 1), lambda i: (0, 0)),          # resident predict weight
            pl.BlockSpec(memory_space=pltpu.MemorySpace.SMEM),   # b_pred scalar in SMEM
            pl.BlockSpec((1, tpm), lambda i: (0, i)),            # streamed 1/cnt mask
        ],
        out_specs=pl.BlockSpec((1, tile_p), lambda i: (0, i)),   # 128-lane-dense rows
        compiler_params=pltpu.CompilerParams(
            dimension_semantics=("parallel",),
            vmem_limit_bytes=32 * 1024 * 1024),
    )(xT, wT_block, w_pred_col, b_pred, mask_row)
    return out[0]


def build_padded_layout(concepts, items, stus, item_concept_graph, stu_item_graph,
                        tile_p):
    """Host glue replicating the pandas id->index lookups and building the padded
    (pair, concept-slot) layout: entry column = block*TILE*MAX_C + slot*TILE + pair."""
    cidx = {int(c): i for i, c in enumerate(np.asarray(concepts))}
    iidx = {int(t): i for i, t in enumerate(np.asarray(items))}
    sidx = {int(s): i for i, s in enumerate(np.asarray(stus))}

    stu_to_items = {}
    for s, t in stu_item_graph:
        stu_to_items.setdefault(int(s), set()).add(int(t))
    item_to_concs = {}
    for t, c in item_concept_graph:
        item_to_concs.setdefault(int(t), set()).add(int(c))

    pairs = []  # (stu_idx, item_idx, [concept_idx, ...]) in original pred order
    for s in np.asarray(stus):
        for t in sorted(stu_to_items.get(int(s), ())):       # np.unique -> sorted
            concs = sorted(item_to_concs[int(t)])             # np.unique -> sorted
            pairs.append((sidx[int(s)], iidx[int(t)], [cidx[c] for c in concs]))

    n_pairs = len(pairs)
    max_c = max(len(p[2]) for p in pairs)
    n_blocks = -(-n_pairs // tile_p)
    n_pairs_pad = n_blocks * tile_p

    shp = (n_blocks, max_c, tile_p)
    stu_rows = np.zeros(shp, np.int32)
    item_rows = np.zeros(shp, np.int32)
    conc_rows = np.zeros(shp, np.int32)
    inv_cnt = np.zeros(shp, np.float32)
    for p_idx, (si, ti, concs) in enumerate(pairs):
        b, j = divmod(p_idx, tile_p)
        w = 1.0 / len(concs)
        for ci, co in enumerate(concs):
            stu_rows[b, ci, j] = si
            item_rows[b, ci, j] = ti
            conc_rows[b, ci, j] = co
            inv_cnt[b, ci, j] = w
    return (n_pairs, n_pairs_pad, max_c,
            stu_rows.reshape(-1), item_rows.reshape(-1), conc_rows.reshape(-1),
            inv_cnt.reshape(1, -1))


def diagnosis_forward(concepts, items, stus, concept_fusion, item_fusion, stu_fusion,
                      item_concept_graph, stu_item_graph, params, tile_p=128):
    w_stu, w_item, w_pred, b_pred = params  # nn.Linear-style: [C,2E], [C,2E], [1,C], [1]
    C, two_e = w_stu.shape
    E = two_e // 2

    (n_pairs, n_pairs_pad, max_c, stu_rows, item_rows, conc_rows,
     inv_cnt) = build_padded_layout(concepts, items, stus, item_concept_graph,
                                    stu_item_graph, tile_p)

    stu_feat = jnp.take(jnp.asarray(stu_fusion), jnp.asarray(stu_rows), axis=0)
    item_feat = jnp.take(jnp.asarray(item_fusion), jnp.asarray(item_rows), axis=0)
    conc_feat = jnp.take(jnp.asarray(concept_fusion), jnp.asarray(conc_rows), axis=0)

    # fused, de-duplicated input slab, transposed so entries run along lanes
    x = jnp.concatenate([stu_feat, item_feat, conc_feat], axis=1)   # [n_entries, 3E]
    xT = x.T.astype(jnp.bfloat16)                                   # [3E, n_entries]

    # fused block weight (transposed): rows 0..C-1 student path, C..2C-1 item path
    wT = np.zeros((2 * C, 3 * E), np.float32)
    wT[:C, :E] = np.asarray(w_stu)[:, :E]          # stu path  <- stu features
    wT[:C, 2 * E:] = np.asarray(w_stu)[:, E:]      # stu path  <- concept features
    wT[C:, E:2 * E] = np.asarray(w_item)[:, :E]    # item path <- item features
    wT[C:, 2 * E:] = np.asarray(w_item)[:, E:]     # item path <- concept features
    wT = jnp.asarray(wT, jnp.bfloat16)

    w_pred_col = jnp.asarray(w_pred, jnp.float32).reshape(C, 1)
    b_pred_sc = jnp.asarray(b_pred, jnp.float32).reshape(1, 1)
    mask_row = jnp.asarray(inv_cnt, jnp.float32)

    pred_pad = diagnosis_pallas(xT, wT, w_pred_col, b_pred_sc, mask_row,
                                tile_p=tile_p, max_c=max_c)
    pred = pred_pad[:n_pairs]

    # pure-JAX reference (same bf16 operand quantization, original un-fused math)
    stu_in = jnp.concatenate([stu_feat, conc_feat], axis=1).astype(jnp.bfloat16)
    item_in = jnp.concatenate([item_feat, conc_feat], axis=1).astype(jnp.bfloat16)
    stu_out = jax.nn.sigmoid(jnp.dot(stu_in, jnp.asarray(w_stu, jnp.bfloat16).T,
                                     preferred_element_type=jnp.float32))
    item_out = jax.nn.sigmoid(jnp.dot(item_in, jnp.asarray(w_item, jnp.bfloat16).T,
                                      preferred_element_type=jnp.float32))
    p_ref = jax.nn.sigmoid((stu_out - item_out) @ w_pred_col + b_pred_sc[0, 0])[:, 0]
    n_blocks = n_pairs_pad // tile_p
    pred_ref = ((p_ref * mask_row[0]).reshape(n_blocks, max_c, tile_p)
                .sum(axis=1).reshape(-1)[:n_pairs])
    return pred, pred_ref


if __name__ == "__main__":
    concept_num, emb_dim = 8, 16
    n_stu, n_item = 24, 12
    TILE_P = 128

    concepts = np.arange(100, 100 + concept_num)
    items = np.arange(200, 200 + n_item)
    stus = np.arange(10, 10 + n_stu)

    # deterministic synthetic bipartite graphs (~156 pairs -> 2 grid steps)
    stu_item_graph = []
    for si in range(n_stu):
        for t in range(5 + si % 4):
            stu_item_graph.append((int(stus[si]), int(items[(si + 5 * t) % n_item])))
    item_concept_graph = []
    for ii in range(n_item):
        for q in range(2 + ii % 3):
            item_concept_graph.append((int(items[ii]),
                                       int(concepts[(ii + 2 * q) % concept_num])))

    key = jax.random.PRNGKey(0)
    k1, k2, k3, k4, k5, k6, k7 = jax.random.split(key, 7)
    concept_fusion = jax.random.normal(k1, (concept_num, emb_dim), jnp.float32)
    item_fusion = jax.random.normal(k2, (n_item, emb_dim), jnp.float32)
    stu_fusion = jax.random.normal(k3, (n_stu, emb_dim), jnp.float32)

    lim1 = 1.0 / np.sqrt(2 * emb_dim)
    lim2 = 1.0 / np.sqrt(concept_num)
    w_stu = jax.random.uniform(k4, (concept_num, 2 * emb_dim), jnp.float32, -lim1, lim1)
    w_item = jax.random.uniform(k5, (concept_num, 2 * emb_dim), jnp.float32, -lim1, lim1)
    w_pred = jax.random.uniform(k6, (1, concept_num), jnp.float32, -lim2, lim2)
    b_pred = jax.random.uniform(k7, (1,), jnp.float32, -lim2, lim2)
    params = (w_stu, w_item, w_pred, b_pred)

    pred, pred_ref = diagnosis_forward(
        concepts, items, stus, concept_fusion, item_fusion, stu_fusion,
        item_concept_graph, stu_item_graph, params, tile_p=TILE_P)

    pred = jax.block_until_ready(pred)
    np.testing.assert_allclose(np.asarray(pred), np.asarray(pred_ref),
                               rtol=1e-2, atol=2e-3)
    assert not bool(jnp.any(jnp.isnan(pred)))
    assert float(jnp.max(pred)) <= 1.0 and float(jnp.min(pred)) >= 0.0
    print("KERNEL_OK")
</pallas_src>

<mosaic_0001>
module attributes {stable_mosaic.version = 11 : i64} {
  func.func @_diagnosis_kernel(%arg0: i32, %arg1: memref<48x512xbf16, #tpu.memory_space<vmem>>, %arg2: memref<16x48xbf16, #tpu.memory_space<vmem>>, %arg3: memref<8x1xf32, #tpu.memory_space<vmem>>, %arg4: memref<1x1xf32, #tpu.memory_space<smem>>, %arg5: memref<1x512xf32, #tpu.memory_space<vmem>>, %arg6: memref<1x128xf32, #tpu.memory_space<vmem>>) attributes {dimension_semantics = [#tpu.dimension_semantics<parallel>], iteration_bounds = array<i64: 2>, scalar_prefetch = 0 : i64, scratch_operands = 0 : i64, tpu.core_type = #tpu.core_type<tc>, window_params = [{transform_indices = @transform_0, window_bounds = array<i64: 48, 512>}, {pipeline_mode = #tpu.pipeline_mode<synchronous>, transform_indices = @transform_1, window_bounds = array<i64: 16, 48>}, {pipeline_mode = #tpu.pipeline_mode<synchronous>, transform_indices = @transform_2, window_bounds = array<i64: 8, 1>}, {transform_indices = @transform_3, window_bounds = array<i64: 1, 1>}, {transform_indices = @transform_4, window_bounds = array<i64: 1, 512>}, {transform_indices = @transform_5, window_bounds = array<i64: 1, 128>}]} {
    %c0 = arith.constant 0 : index
    %c0_0 = arith.constant 0 : index
    %0 = vector.load %arg2[%c0, %c0_0] : memref<16x48xbf16, #tpu.memory_space<vmem>>, vector<16x48xbf16>
    %c0_1 = arith.constant 0 : index
    %c0_2 = arith.constant 0 : index
    %1 = vector.load %arg1[%c0_1, %c0_2] : memref<48x512xbf16, #tpu.memory_space<vmem>>, vector<48x512xbf16>
    %cst = arith.constant dense<0.000000e+00> : vector<16x512xf32>
    %2 = tpu.matmul %0, %1, %cst {dimension_numbers = #tpu.dot_dimension_numbers<[1], [0], [0], [1], [0, 0, 1, 1], [], []>} : vector<16x48xbf16>, vector<48x512xbf16>, vector<16x512xf32> -> vector<16x512xf32>
    %3 = arith.negf %2 : vector<16x512xf32>
    %4 = math.exp %3 : vector<16x512xf32>
    %cst_3 = arith.constant 1.000000e+00 : f32
    %5 = vector.broadcast %cst_3 : f32 to vector<16x512xf32>
    %6 = arith.addf %5, %4 : vector<16x512xf32>
    %7 = arith.divf %5, %6 : vector<16x512xf32>
    %8 = vector.extract_strided_slice %7 {offsets = [0, 0], sizes = [8, 512], strides = [1, 1]} : vector<16x512xf32> to vector<8x512xf32>
    %9 = vector.extract_strided_slice %7 {offsets = [8, 0], sizes = [8, 512], strides = [1, 1]} : vector<16x512xf32> to vector<8x512xf32>
    %10 = arith.subf %8, %9 : vector<8x512xf32>
    %c0_4 = arith.constant 0 : index
    %c0_5 = arith.constant 0 : index
    %11 = vector.load %arg3[%c0_4, %c0_5] : memref<8x1xf32, #tpu.memory_space<vmem>>, vector<8x1xf32>
    %12 = vector.broadcast %11 : vector<8x1xf32> to vector<8x512xf32>
    %13 = arith.mulf %10, %12 : vector<8x512xf32>
    %cst_6 = arith.constant dense<0.000000e+00> : vector<512xf32>
    %14 = vector.multi_reduction <add>, %13, %cst_6 [0] : vector<8x512xf32> to vector<512xf32>
    %15 = vector.shape_cast %14 : vector<512xf32> to vector<1x512xf32>
    %c0_7 = arith.constant 0 : index
    %c0_8 = arith.constant 0 : index
    %16 = memref.load %arg4[%c0_7, %c0_8] : memref<1x1xf32, #tpu.memory_space<smem>>
    %17 = vector.broadcast %16 : f32 to vector<1x512xf32>
    %18 = arith.addf %15, %17 : vector<1x512xf32>
    %19 = arith.negf %18 : vector<1x512xf32>
    %20 = math.exp %19 : vector<1x512xf32>
    %cst_9 = arith.constant 1.000000e+00 : f32
    %21 = vector.broadcast %cst_9 : f32 to vector<1x512xf32>
    %22 = arith.addf %21, %20 : vector<1x512xf32>
    %23 = arith.divf %21, %22 : vector<1x512xf32>
    %c0_10 = arith.constant 0 : index
    %c0_11 = arith.constant 0 : index
    %24 = vector.load %arg5[%c0_10, %c0_11] : memref<1x512xf32, #tpu.memory_space<vmem>>, vector<1x512xf32>
    %25 = arith.mulf %23, %24 : vector<1x512xf32>
    %26 = vector.extract_strided_slice %25 {offsets = [0, 0], sizes = [1, 128], strides = [1, 1]} : vector<1x512xf32> to vector<1x128xf32>
    %27 = vector.extract_strided_slice %25 {offsets = [0, 128], sizes = [1, 128], strides = [1, 1]} : vector<1x512xf32> to vector<1x128xf32>
    %28 = arith.addf %26, %27 : vector<1x128xf32>
    %29 = vector.extract_strided_slice %25 {offsets = [0, 256], sizes = [1, 128], strides = [1, 1]} : vector<1x512xf32> to vector<1x128xf32>
    %30 = arith.addf %28, %29 : vector<1x128xf32>
    %31 = vector.extract_strided_slice %25 {offsets = [0, 384], sizes = [1, 128], strides = [1, 1]} : vector<1x512xf32> to vector<1x128xf32>
    %32 = arith.addf %30, %31 : vector<1x128xf32>
    %c0_12 = arith.constant 0 : index
    %c0_13 = arith.constant 0 : index
    %33 = vector.load %arg6[%c0_12, %c0_13] : memref<1x128xf32, #tpu.memory_space<vmem>>, vector<1x128xf32>
    tpu.vector_store %arg6[%c0_12, %c0_13], %32 {strides = array<i32>} : memref<1x128xf32, #tpu.memory_space<vmem>>, vector<1x128xf32>,
    return
  }
  func.func @transform_0(%arg0: i32) -> (i32, i32) {
    %c0_i32 = arith.constant 0 : i32
    %c0_i32_0 = arith.constant 0 : i32
    return %c0_i32, %arg0 : i32, i32
  }
  func.func @transform_1(%arg0: i32) -> (i32, i32) {
    %c0_i32 = arith.constant 0 : i32
    %c0_i32_0 = arith.constant 0 : i32
    %c0_i32_1 = arith.constant 0 : i32
    return %c0_i32, %c0_i32_0 : i32, i32
  }
  func.func @transform_2(%arg0: i32) -> (i32, i32) {
    %c0_i32 = arith.constant 0 : i32
    %c0_i32_0 = arith.constant 0 : i32
    %c0_i32_1 = arith.constant 0 : i32
    return %c0_i32, %c0_i32_0 : i32, i32
  }
  func.func @transform_3(%arg0: i32) -> (i32, i32) {
    %c0_i32 = arith.constant 0 : i32
    %c0_i32_0 = arith.constant 0 : i32
    %c0_i32_1 = arith.constant 0 : i32
    return %c0_i32, %c0_i32_0 : i32, i32
  }
  func.func @transform_4(%arg0: i32) -> (i32, i32) {
    %c0_i32 = arith.constant 0 : i32
    %c0_i32_0 = arith.constant 0 : i32
    return %c0_i32, %arg0 : i32, i32
  }
  func.func @transform_5(%arg0: i32) -> (i32, i32) {
    %c0_i32 = arith.constant 0 : i32
    %c0_i32_0 = arith.constant 0 : i32
    return %c0_i32, %arg0 : i32, i32
  }
}

</mosaic_0001>

<bundles_post_ra>
// kernel: tpu_custom_call.1
= control target key start
LH: loop header
LB: loop body
LE: loop exit
PB: predicated region body
PF: predicated region fallthrough
CT: control target
= control target key end

     0   :  { %s1129_s0 = inlined_call_operand.hbm [shape: bf16[48,1024], index: 0, kind: input, shape index: {}]   ;;  %s1130_s1 = inlined_call_operand.vmem [shape: bf16[16,48], index: 1, kind: input, shape index: {}]   ;;  %s1131_s2 = inlined_call_operand.vmem [shape: f32[8,1], index: 2, kind: input, shape index: {}]   ;;  %s1132_s3 = inlined_call_operand.<no memory space> [shape: f32[1,1], index: 3, kind: input, shape index: {}]   ;;  %s1133_s4 = inlined_call_operand.vmem [shape: f32[1,1024], index: 4, kind: input, shape index: {}]   ;;  %s1134_s5 = inlined_call_operand.hbm [shape: f32[1,256], index: 5, kind: output, shape index: {}]  }
   0x1   :  { %10 = sst [smem:[#allocation2]] %s1132_s3 }
   0x2   :  { %11 = vsyncpa [#allocation4], 0 }
   0x3   :  { %13 = vsyncpa [#allocation4 + $0x1], 0 }
   0x4   :  { %14 = vsyncpa [#allocation5], 0 }
   0x5   :  { %16 = vsyncpa [#allocation5 + $0x1], 0  ;;  %s962_s20 = smov 0   ;;  %s964_s21 = smov 0  }
   0x6   :  { %s966_s22 = smov 0   ;;  %s968_s23 = smov 0  }
   0x7 LB: > { %s983_s3 = sadd.s32 4294967295, %s921_s23   ;;  %s667_s24 = sadd.s32 4294967294, %s921_s23   ;;  %s921_s23 = sphi %s968_s23, %s1147_s23   ;;  %s917_s22 = sphi %s966_s22, %s1146_s22   ;;  %s913_s21 = sphi %s964_s21, %s1145_s21   ;;  %s909_s20 = sphi %s962_s20, %s1144_s20  }
   0x8   : > { %s987_s25 = sadd.s32 1, %s921_s23   ;;  %s29_s26 = sadd.s32 1, %s917_s22 }
   0x9   : > { %s26_s27 = ssub.s32 %s921_s23, %s987_s25  ;;  %p36_p0 = scmp.ne.s32.totalorder %s917_s22, %s913_s21 }
   0xa   : > { %p27_p1 = scmp.eq.s32.totalorder %s26_s27, 0  ;;  %p37_p2 = scmp.eq.s32.totalorder %s921_s23, 0 }
   0xb   : > { %p42_p3 = scmp.ne.s32.totalorder %s913_s21, %s909_s20  ;;  %p43_p4 = scmp.eq.s32.totalorder %s983_s3, 0 }
   0xc   : > { %s999_s28 = scalar_select %p27_p1, %s917_s22, %s29_s26  }
   0xd   : > { %p38_p5 = por %p37_p2, %p36_p0  ;;  %p1001_p6 = por %p43_p4, %p42_p3 }
   0xe   : > { %p155_p7 = scmp.eq.s32.totalorder %s983_s3, 1  ;;  %p161_p8 = scmp.eq.s32.totalorder %s667_s24, 1 }
   0xf   : > { %p719_p10 = scmp.lt.s32.totalorder %s921_s23, 2  ;;  %s190_s7 = sand.u32 1, %s917_s22  }
  0x10   : > { %p1008_p11 = por %p155_p7, %p36_p0  ;;  %p1012_p12 = por %p161_p8, %p42_p3 }
  0x11   : > { %s704_s8 = sshll.u32 %s921_s23, 8  ;;  %s705_s9 = smul.u32 96, %s190_s7 }
  0x12   : > { %s1137_s30 = scalar_select %p1008_p11, 1, 0 }
  0x13   : > { %s1138_s6 = scalar_select %p1012_p12, 1, 0 }
  0x14   : > { %s1021_s12 = scalar_lea.hbm %s1129_s0, %s704_s8  ;;  %p1023_p13 = pnand %p719_p10, %p38_p5 }
  0x15   : > { %s194_s14 = scalar_lea.vmem [#allocation3], %s705_s9  ;;  %s1030_s16 = scalar_lea.sflag [#allocation4], %s190_s7 }
  0x16   : > { %s201_s15 = sshll.u32 %s194_s14, 4  ;;  %s825_s17 = scalar_lea.hbm %s1021_s12, 1536  ;;  %s1027_s15 = int_to_ptr.vmem [resolvable:$true] %s201_s15 }
  0x17   : > { %p826_p1 = scmp.ne.s32.totalorder %s1021_s12, %s825_s17  ;;  %p827_p2 = pneg %p1023_p13 }
  0x18   : > { %s830_s24 = scalar_lea.hbm %s1129_s0, 3072  ;;  %p831_p5 = scmp.lt.u32.totalorder %s1021_s12, %s1129_s0 }
  0x19   : > { %p828_p3 = pnand %p827_p2, %p826_p1  ;;  %p832_p7 = scmp.lt.u32.totalorder %s830_s24, %s825_s17 }
  0x1a   : > { %p834_p10 = scmp.lt.u32.totalorder %s825_s17, %s1021_s12 }
  0x1b   : > { %p829_p4 = pneg %p828_p3  ;;  %p833_p8 = por %p832_p7, %p831_p5 }
  0x1d   : > { %p835_p9 = por %p834_p10, %p833_p8 }
  0x1f   : > { %p836_p0 = pnand %p835_p9, %p829_p4 }
  0x21   : > { %839 = shalt.err (!%p836_p0)
}
  0x22   : > { %s840_s7 = scalar_lea.vmem %s1027_s15, 1536  ;;  %s923_s8 = smov [#allocation3]  }
  0x23   : > { %p841_p1 = scmp.ne.s32.totalorder %s1027_s15, %s840_s7  ;;  %s845_s9 = sshll.u32 %s923_s8, 4  ;;  %s846_s9 = int_to_ptr.vmem [resolvable:$false] %s845_s9 }
  0x24   : > { %s847_s10 = scalar_lea.vmem %s846_s9, 3072  ;;  %p848_p11 = scmp.lt.s32.totalorder %s1027_s15, %s846_s9 }
  0x25   : > { %p843_p3 = pnand %p841_p1, %p827_p2  ;;  %p849_p5 = scmp.lt.s32.totalorder %s847_s10, %s840_s7 }
  0x27   : > { %p844_p12 = pneg %p843_p3  ;;  %p850_p7 = por %p849_p5, %p848_p11 }
  0x29   : > { %p851_p8 = pnand %p850_p7, %p844_p12 }
  0x2b   : > { %854 = shalt.err (!%p851_p8)
}
  0x2c   : > { %s924_s11 = smov 512   ;;  %s925_s14 = smov 256  }
  0x2d   : > { %s926_s17 = smov 16   ;;  %p217_p9 = scmp.lt.s32.totalorder %s921_s23, 3 }
  0x2e   : > { %714 = dma.hbm_to_vmem [thread:$0]  (!%p1023_p13), %s1021_s12, 1536, %s1027_s15, %s1030_s16, %s924_s11, %s925_s14, %s926_s17  }
  0x2f   : > { %p1140_p0 = scmp.ge.s32.totalorder %s921_s23, 1 }
  0x31   : > { %p218_p2 = pnand %p1140_p0, %p217_p9 }
  0x32   : > { %s1062_s18 = sand.u32 (!%p218_p2), 1, %s913_s21  }
  0x33   : > { %221 = sbr.rel (%p218_p2) target bundleno = 383 (0x17f), region = 40  ;;  %s224_s24 = scalar_lea.sflag (!%p218_p2), [#allocation4], %s1062_s18 }
  0x34   : > { %s706_s19 = smul.u32 (!%p218_p2), 96, %s1062_s18 }
  0x36   : > { %s227_s26 = scalar_lea.vmem (!%p218_p2), [#allocation3], %s706_s19 }
  0x3a   : > { %900 = dma.done.wait (%p1001_p6), %s224_s24, 1536  }
  0x3b   : > { %902 = vsyncadd (%p1001_p6), %s224_s24, 4294965760  ;;  %v927_v0 = vmov 0   ;;  %v758_v1 = vld [vmem:[%s227_s26 + $0x4] ss:$16 sps:$4 sm:$0xff]   ;;  %v760_v2 = vld [vmem:[%s227_s26 + $0xc] ss:$16 sps:$4 sm:$0xff]  }
  0x3c   : > { %379 = vmatprep.mubr.bf16.mxu0 %v927_v0  ;;  %422 = vmatprep.mubr.bf16.mxu1 %v927_v0  ;;  %v762_v3 = vld [vmem:[%s227_s26] ss:$16 sps:$4 sm:$0xff]   ;;  %v763_v4 = vld [vmem:[%s227_s26 + $0x8] ss:$16 sps:$4 sm:$0xff]   ;;  %v764_v5 = vld [vmem:[%s227_s26 + $0x24] ss:$16 sps:$4 sm:$0xff]  }
  0x3d   : > { %757 = vset.pattern.permute.xlu0 %v927_v0  ;;  %347 = vmatprep.subr.bf16.mxu0 %v758_v1  ;;  %v766_v6 = vld [vmem:[%s227_s26 + $0x2c] ss:$16 sps:$4 sm:$0xff]   ;;  %v768_v7 = vld [vmem:[%s227_s26 + $0x20] ss:$16 sps:$4 sm:$0xff]   ;;  %v769_v8 = vld [vmem:[%s227_s26 + $0x28] ss:$16 sps:$4 sm:$0xff]  }
  0x3e   : > { %390 = vmatprep.subr.bf16.mxu1 %v760_v2  ;;  %348 = vmatpush1.bf16.msra.mxu0 %v762_v3  ;;  %v770_v9 = vld [vmem:[%s227_s26 + $0x44] ss:$16 sps:$4 sm:$0xff]   ;;  %v772_v10 = vld [vmem:[%s227_s26 + $0x4c] ss:$16 sps:$4 sm:$0xff]   ;;  %v774_v11 = vld [vmem:[%s227_s26 + $0x40] ss:$16 sps:$4 sm:$0xff]  }
  0x3f   : > { %391 = vmatpush1.bf16.msra.mxu1 %v763_v4  ;;  %349 = vmatprep.subr.bf16.mxu0 %v764_v5  ;;  %v775_v12 = vld [vmem:[%s227_s26 + $0x48] ss:$16 sps:$4 sm:$0xff]   ;;  %v485_v13 = vld [vmem:[%s1131_s2] sm:$0xff]  ;;  %vm343_vm0 = vcmask 392192   ;;  %s519_s16 = sld [smem:[#allocation2]]  ;;  %s673_s27 = sshll.u32 %s983_s3, 2 }
  0x40   : > { %392 = vmatprep.subr.bf16.mxu1 %v766_v6  ;;  %488 = vperm.xlu0 %757, %v485_v13   ;;  %v776_v14 = vld [vmem:[%s1130_s1] sm:$0xff]   ;;  %p259_p6 = scmp.lt.s32.totalorder %s673_s27, 7  ;;  %s701_s10 = sshll.u32 %s983_s3, 4 }
  0x41   : > { %s256_s11 = scalar_lea.vmem [#allocation6], %s1062_s18  ;;  %s1085_s24 = scalar_lea.hbm %s1134_s5, %s701_s10 }
  0x42   : > { %350 = vmatpush1.bf16.msra.mxu0 %v768_v7  ;;  %s1149_s27 = smov (!%p259_p6, %s673_s27), 7  ;;  %s592_s14 = sshll.u32 %s256_s11, 4  ;;  %s1087_s14 = int_to_ptr.vmem [resolvable:$true] %s592_s14 }
  0x43   : > { %393 = vmatpush1.bf16.msra.mxu1 %v769_v8  ;;  %351 = vmatprep.subr.bf16.mxu0 %v770_v9  ;;  %s261_s9 = scalar_lea.vmem %s1133_s4, %s1149_s27  ;;  %s580_s26 = scalar_lea.sflag [#allocation5], %s1062_s18 }
  0x44   : > { %394 = vmatprep.subr.bf16.mxu1 %v772_v10  ;;  %s855_s29 = scalar_lea.vmem %s1087_s14, 16  ;;  %p1141_p12 = scmp.ne.s32.totalorder %s1137_s30, 0 }
  0x45   : > { %p856_p11 = scmp.ne.s32.totalorder %s1087_s14, %s855_s29  ;;  %s928_s3 = smov [#allocation6]  }
  0x46   : > { %352 = vmatpush1.bf16.msra.mxu0 %v774_v11  ;;  %s859_s12 = sshll.u32 %s928_s3, 4  ;;  %s860_s12 = int_to_ptr.vmem [resolvable:$false] %s859_s12 }
  0x47   : > { %395 = vmatpush1.bf16.msra.mxu1 %v775_v12  ;;  %p857_p13 = pnand %p856_p11, %p1141_p12  ;;  %s861_s13 = scalar_lea.vmem %s860_s12, 32 }
  0x48   : > { %p862_p10 = scmp.lt.s32.totalorder %s1087_s14, %s860_s12  ;;  %p863_p1 = scmp.lt.s32.totalorder %s861_s13, %s855_s29 }
  0x49   : > { %687 = vmatmul.mubr.msk.bf16.vlgmr.msra.gmra.mrb[0].mxu0 %vm343_vm0, %v776_v14  ;;  %p858_p4 = pneg %p857_p13 }
  0x4a   : > { %688 = vmatmul.mubr.msk.bf16.vlgmr.msra.gmra.mrb[0].mxu1 %vm343_vm0, %v776_v14  ;;  %p864_p3 = por %p863_p1, %p862_p10 }
  0x4c   : > { %p865_p5 = pnand %p864_p3, %p858_p4 }
  0xbf   : > { %v489_v52 = vpop.permute.xlu0 %488 }
 0x11c   : > { %v381_v15 = vpop.f32.mrb[0].mxu0 }
 0x11d   : > { %v424_v16 = vpop.f32.mrb[0].mxu1  ;;  %v689_v17 = vmul.f32 -1.442695, %v381_v15  ;;  %v383_v19 = vpop.f32.mrb[1].mxu0 }
 0x11e   : > { %v691_v18 = vmul.f32 -1.442695, %v424_v16  ;;  %v426_v20 = vpop.f32.mrb[1].mxu1  ;;  %v690_v21 = vmul.f32 -1.442695, %v383_v19  ;;  %v385_v23 = vpop.f32.mrb[2].mxu0  ;;  %v520_v16 = vstv %s519_s16 }
 0x11f   : > { %v692_v22 = vmul.f32 -1.442695, %v426_v20  ;;  %v428_v24 = vpop.f32.mrb[2].mxu1  ;;  %777 = vpow2.f32 %v689_v17  ;;  %v693_v25 = vmul.f32 -1.442695, %v385_v23  ;;  %v387_v26 = vpop.f32.mrb[3].mxu0 }
 0x120   : > { %v430_v27 = vpop.f32.mrb[3].mxu1  ;;  %779 = vpow2.f32 %v691_v18  ;;  %v695_v28 = vmul.f32 -1.442695, %v428_v24  ;;  %v694_v29 = vmul.f32 -1.442695, %v387_v26 }
 0x121   : > { %781 = vpow2.f32 %v690_v21  ;;  %v696_v30 = vmul.f32 -1.442695, %v430_v27 }
 0x122   : > { %783 = vpow2.f32 %v692_v22 }
 0x123   : > { %785 = vpow2.f32 %v693_v25 }
 0x124   : > { %787 = vpow2.f32 %v695_v28 }
 0x125   : > { %789 = vpow2.f32 %v694_v29 }
 0x126   : > { %791 = vpow2.f32 %v696_v30 }
 0x129   : > { %v778_v31 = vpop.eup %777 }
 0x12a   : > { %v780_v32 = vpop.eup %779  ;;  %v457_v33 = vadd.f32 1.0, %v778_v31 }
 0x12b   : > { %v782_v34 = vpop.eup %781  ;;  %v459_v35 = vadd.f32 1.0, %v780_v32 }
 0x12c   : > { %v784_v36 = vpop.eup %783  ;;  %793 = vrcp.f32 %v457_v33  ;;  %v458_v37 = vadd.f32 1.0, %v782_v34  ;;  %v551_v33 = vlaneseq }
 0x12d   : > { %v786_v38 = vpop.eup %785  ;;  %795 = vrcp.f32 %v459_v35  ;;  %v460_v39 = vadd.f32 1.0, %v784_v36 }
 0x12e   : > { %v788_v40 = vpop.eup %787  ;;  %797 = vrcp.f32 %v458_v37  ;;  %v461_v41 = vadd.f32 1.0, %v786_v38 }
 0x12f   : > { %v790_v42 = vpop.eup %789  ;;  %799 = vrcp.f32 %v460_v39  ;;  %v463_v43 = vadd.f32 1.0, %v788_v40  ;;  %v552_v39 = vshrl.u32 %v551_v33, 7 }
 0x130   : > { %v792_v44 = vpop.eup %791  ;;  %801 = vrcp.f32 %v461_v41  ;;  %v462_v45 = vadd.f32 1.0, %v790_v42 }
 0x131   : > { %803 = vrcp.f32 %v463_v43  ;;  %v464_v46 = vadd.f32 1.0, %v792_v44  ;;  %v553_v43 = vsub.s32 0, %v552_v39  ;;  %v549_v44 = vld [vmem:[%s261_s9] sm:$0xf] }
 0x132   : > { %805 = vrcp.f32 %v462_v45  ;;  %v557_v45 = vsub.s32 1, %v552_v39 }
 0x133   : > { %807 = vrcp.f32 %v464_v46  ;;  %v554_v46 = vrot.slane %v549_v44, %v553_v43 }
 0x136   : > { %v794_v47 = vpop.eup %793 }
 0x137   : > { %v796_v48 = vpop.eup %795 }
 0x138   : > { %v798_v49 = vpop.eup %797 }
 0x139   : > { %v800_v50 = vpop.eup %799 }
 0x13a   : > { %v802_v51 = vpop.eup %801 }
 0x13b   : > { %v804_v53 = vpop.eup %803  ;;  %v481_v54 = vsub.f32 %v794_v47, %v802_v51  ;;  %v561_v47 = vsub.s32 2, %v552_v39 }
 0x13c   : > { %v806_v55 = vpop.eup %805  ;;  %v483_v56 = vsub.f32 %v796_v48, %v804_v53  ;;  %v558_v48 = vrot.slane %v549_v44, %v557_v45 }
 0x13d   : > { %v808_v57 = vpop.eup %807  ;;  %v482_v58 = vsub.f32 %v798_v49, %v806_v55  ;;  %v491_v59 = vmul.f32 %v489_v52, %v481_v54  ;;  %v565_v49 = vsub.s32 3, %v552_v39 }
 0x13e   : > { %v484_v60 = vsub.f32 %v800_v50, %v808_v57  ;;  %v493_v61 = vmul.f32 %v489_v52, %v483_v56 }
 0x13f   : > { %v492_v62 = vmul.f32 %v489_v52, %v482_v58  ;;  %v495_v63 = vrot.slane %v491_v59, 4  ;;  %v566_v55 = vrot.slane %v549_v44, %v565_v49 }
 0x140   : > { %v494_v0 = vmul.f32 %v489_v52, %v484_v60  ;;  %v507_v1 = vrot.slane %v493_v61, 4  ;;  %v562_v52 = vrot.slane %v549_v44, %v561_v47 }
 0x141   : > { %v496_v2 = vadd.f32 %v495_v63, %v491_v59  ;;  %v501_v3 = vrot.slane %v492_v62, 4 }
 0x142   : > { %v508_v4 = vadd.f32 %v507_v1, %v493_v61  ;;  %v513_v5 = vrot.slane %v494_v0, 4 }
 0x143   : > { %v497_v6 = vrot.slane %v496_v2, 2  ;;  %v502_v7 = vadd.f32 %v501_v3, %v492_v62 }
 0x144   : > { %v509_v8 = vrot.slane %v508_v4, 2  ;;  %v514_v9 = vadd.f32 %v513_v5, %v494_v0 }
 0x145   : > { %v498_v10 = vadd.f32 %v497_v6, %v496_v2  ;;  %v503_v11 = vrot.slane %v502_v7, 2 }
 0x146   : > { %v510_v12 = vadd.f32 %v509_v8, %v508_v4  ;;  %v515_v13 = vrot.slane %v514_v9, 2 }
 0x147   : > { %v499_v14 = vrot.slane %v498_v10, 1  ;;  %v504_v15 = vadd.f32 %v503_v11, %v502_v7 }
 0x148   : > { %v511_v17 = vrot.slane %v510_v12, 1  ;;  %v516_v18 = vadd.f32 %v515_v13, %v514_v9 }
 0x149   : > { %v500_v19 = vadd.f32 %v499_v14, %v498_v10  ;;  %v505_v20 = vrot.slane %v504_v15, 1 }
 0x14a   : > { %v512_v21 = vadd.f32 %v511_v17, %v510_v12  ;;  %v517_v22 = vrot.slane %v516_v18, 1 }
 0x14b   : > { %v506_v23 = vadd.f32 %v505_v20, %v504_v15  ;;  %v521_v24 = vadd.f32 %v520_v16, %v500_v19 }
 0x14c   : > { %v518_v25 = vadd.f32 %v517_v22, %v516_v18  ;;  %v523_v26 = vadd.f32 %v520_v16, %v512_v21 }
 0x14d   : > { %v522_v27 = vadd.f32 %v520_v16, %v506_v23  ;;  %v697_v28 = vmul.f32 -1.442695, %v521_v24 }
 0x14e   : > { %v524_v29 = vadd.f32 %v520_v16, %v518_v25  ;;  %v699_v30 = vmul.f32 -1.442695, %v523_v26 }
 0x14f   : > { %809 = vpow2.f32 %v697_v28  ;;  %v698_v31 = vmul.f32 -1.442695, %v522_v27 }
 0x150   : > { %811 = vpow2.f32 %v699_v30  ;;  %v700_v32 = vmul.f32 -1.442695, %v524_v29 }
 0x151   : > { %813 = vpow2.f32 %v698_v31 }
 0x152   : > { %815 = vpow2.f32 %v700_v32 }
 0x159   : > { %v810_v34 = vpop.eup %809 }
 0x15a   : > { %v812_v35 = vpop.eup %811  ;;  %v537_v36 = vadd.f32 1.0, %v810_v34 }
 0x15b   : > { %v814_v37 = vpop.eup %813  ;;  %v539_v38 = vadd.f32 1.0, %v812_v35 }
 0x15c   : > { %v816_v40 = vpop.eup %815  ;;  %v538_v41 = vadd.f32 1.0, %v814_v37  ;;  %817 = vrcp.f32 %v537_v36 }
 0x15d   : > { %v540_v42 = vadd.f32 1.0, %v816_v40  ;;  %819 = vrcp.f32 %v539_v38 }
 0x15e   : > { %821 = vrcp.f32 %v538_v41 }
 0x15f   : > { %823 = vrcp.f32 %v540_v42 }
 0x166   : > { %v818_v50 = vpop.eup %817 }
 0x167   : > { %v820_v51 = vpop.eup %819  ;;  %v571_v53 = vmul.f32 %v818_v50, %v554_v46 }
 0x168   : > { %v822_v54 = vpop.eup %821  ;;  %v573_v58 = vmul.f32 %v820_v51, %v562_v52 }
 0x169   : > { %v572_v56 = vmul.f32 %v822_v54, %v558_v48  ;;  %v824_v57 = vpop.eup %823 }
 0x16a   : > { %v574_v60 = vmul.f32 %v824_v57, %v566_v55 }
 0x16b   : > { %v575_v59 = vadd.f32 %v572_v56, %v571_v53 }
 0x16d   : > { %v576_v61 = vadd.f32 %v575_v59, %v573_v58 }
 0x16f   : > { %v577_v62 = vadd.f32 %v576_v61, %v574_v60 }
 0x171   : > { %578 = vst [vmem:[%s256_s11] sm:$0x1] %v577_v62 }
 0x172   : > { %868 = shalt.err (!%p865_p5)
}
 0x173   : > { %s869_s18 = scalar_lea.hbm %s1085_s24, 16  ;;  %s873_s27 = scalar_lea.hbm %s1134_s5, 32 }
 0x174   : > { %p870_p7 = scmp.ne.s32.totalorder %s1085_s24, %s869_s18  ;;  %p874_p0 = scmp.lt.u32.totalorder %s1085_s24, %s1134_s5 }
 0x175   : > { %p875_p2 = scmp.lt.u32.totalorder %s873_s27, %s869_s18  ;;  %p877_p11 = scmp.lt.u32.totalorder %s869_s18, %s1085_s24 }
 0x176   : > { %p871_p8 = pnand %p870_p7, %p1141_p12 }
 0x177   : > { %p876_p6 = por %p875_p2, %p874_p0 }
 0x178   : > { %p872_p9 = pneg %p871_p8 }
 0x179   : > { %p878_p13 = por %p877_p11, %p876_p6 }
 0x17b   : > { %p879_p4 = pnand %p878_p13, %p872_p9 }
 0x17d   : > { %882 = shalt.err (!%p879_p4)
}
 0x17e   : > { %709 = dma.vmem_to_hbm [thread:$0]  (%p1141_p12), %s1087_s14, 16, %s1085_s24, %s580_s26  }
 0x17f PF: > { %s604_s9 = sand.u32 1, %s909_s20   ;;  %p1142_p10 = scmp.ne.s32.totalorder %s1138_s6, 0 }
 0x180   : > { %p1143_p1 = scmp.ge.s32.totalorder %s921_s23, 2  ;;  %s605_s10 = scalar_lea.sflag [#allocation5], %s604_s9 }
 0x182   : > { %p716_p3 = pnand %p1143_p1, %p1142_p10 }
 0x184   : > { %904 = dma.done.wait (!%p716_p3), %s605_s10, 16  }
 0x185   : > { %906 = vsyncadd (!%p716_p3), %s605_s10, 4294967280  ;;  %p19_p5 = scmp.ge.s32.totalorder %s987_s25, 4   ;;  %s1144_s20 = smov %s913_s21 }
 0x186   : > { %s1145_s21 = smov %s917_s22  ;;  %s1146_s22 = smov %s999_s28 }
 0x187   : > { %s1147_s23 = smov %s987_s25  ;;  %21 = sbr.rel (!%p19_p5) target bundleno = 7 (0x7), region = 88 }
 0x18e   :  { %609 = vsyncpa [#allocation4], 1 }
 0x18f   :  { %611 = vsyncpa [#allocation4 + $0x1], 1 }
 0x190   :  { %612 = vsyncpa [#allocation5], 1 }
 0x191   :  { %614 = vsyncpa [#allocation5 + $0x1], 1 }

</bundles_post_ra>
